<compile_context>
chip_gen: v7x
topology: tpu7x:2x2x1
jax: 0.10.0
libtpu: 0.0.40
codegen_flags: <defaults>
</compile_context>

<pallas_src>
import jax
import jax.numpy as jnp
from jax import lax
from jax.experimental import pallas as pl
from jax.experimental.pallas import tpu as pltpu


def _attention_kernel(q_ref, w_ref, b_ref, k_ref, v_ref, o_ref):
    # Linear expansion: (Bq, q_dim) @ (q_dim, k_dim) + (1, k_dim) -> (Bq, k_dim)
    q = jnp.dot(q_ref[...], w_ref[...], preferred_element_type=jnp.float32)
    q = q + b_ref[...]

    # torch.inner(q, key): contract the feature axis directly -> (Bq, T).
    # No explicit transpose; T lands on the lane axis.
    scores = lax.dot_general(
        q, k_ref[...],
        dimension_numbers=(((1,), (1,)), ((), ())),
        preferred_element_type=jnp.float32)

    # Numerically-stable softmax over the T axis (last / lane axis), kept
    # unnormalized until after the value matmul.
    m = jnp.max(scores, axis=-1, keepdims=True)
    e = jnp.exp(scores - m)                                   # (Bq, T)
    denom = jnp.sum(e, axis=-1, keepdims=True)                # (Bq, 1)

    # Weighted sum of values as an MXU matmul: (Bq, T) @ (T, v_dim) -> (Bq, v_dim)
    out = jnp.dot(e, v_ref[...], preferred_element_type=jnp.float32)

    # Exact normalization (single divide per output row) -- avoids the
    # approximate-reciprocal error that failed the tolerance check.
    o_ref[...] = (out / denom).astype(o_ref.dtype)


def attention_forward_batched(queries, w, b, key, value, *, block_q=None):
    """queries: (Bq, q_dim), w: (q_dim, k_dim), b: (k_dim,), key: (T, k_dim),
    value: (T, v_dim).  Returns (Bq, v_dim)."""
    queries = queries.astype(jnp.float32)
    w = w.astype(jnp.float32)
    b2 = b.reshape(1, -1).astype(jnp.float32)
    key = key.astype(jnp.float32)
    value = value.astype(jnp.float32)

    Bq, q_dim = queries.shape
    T, k_dim = key.shape
    _, v_dim = value.shape

    if block_q is None:
        block_q = Bq
    assert Bq % block_q == 0, "block_q must divide the query batch"
    grid = (Bq // block_q,)

    # TODO(synk): if T ever scales up, add a grid axis over T with an
    # online-softmax accumulator and size K/V tiles for v7x's 32 MiB scoped VMEM.
    out = pl.pallas_call(
        _attention_kernel,
        out_shape=jax.ShapeDtypeStruct((Bq, v_dim), jnp.float32),
        grid=grid,
        in_specs=[
            pl.BlockSpec((block_q, q_dim), lambda i: (i, 0)),
            pl.BlockSpec((q_dim, k_dim), lambda i: (0, 0)),
            pl.BlockSpec((1, k_dim), lambda i: (0, 0)),
            pl.BlockSpec((T, k_dim), lambda i: (0, 0)),
            pl.BlockSpec((T, v_dim), lambda i: (0, 0)),
        ],
        out_specs=pl.BlockSpec((block_q, v_dim), lambda i: (i, 0)),
        compiler_params=pltpu.CompilerParams(
            dimension_semantics=("parallel",)),
    )(queries, w, b2, key, value)
    return out


def attention_forward(query, w, b, key, value):
    """Single-query forward matching the PyTorch module.
    query: (q_dim,) -> returns (v_dim,)."""
    out = attention_forward_batched(query.reshape(1, -1), w, b, key, value)
    return out.reshape(-1)


def _reference_single(query, w, b, key, value):
    q = query @ w + b                      # (k_dim,)
    scores = key @ q                       # (T,)
    weight = jax.nn.softmax(scores, axis=0)
    return jnp.sum(value * weight[:, None], axis=0)


if __name__ == "__main__":
    # Small shapes consistent with the module's forward pass.
    q_dim, k_dim, v_dim, T = 32, 32, 16, 8

    root = jax.random.PRNGKey(0)
    kq, kk, kv, kw, kb, kqb = jax.random.split(root, 6)

    query = jax.random.normal(kq, (q_dim,), dtype=jnp.float32)
    key = jax.random.normal(kk, (T, k_dim), dtype=jnp.float32)
    value = jax.random.normal(kv, (T, v_dim), dtype=jnp.float32)

    # Deterministic Linear(q_dim, k_dim) params (uniform like PyTorch default).
    bound = 1.0 / (q_dim ** 0.5)
    w = jax.random.uniform(kw, (q_dim, k_dim), minval=-bound, maxval=bound,
                           dtype=jnp.float32)
    b = jax.random.uniform(kb, (k_dim,), minval=-bound, maxval=bound,
                           dtype=jnp.float32)

    # --- single-query path: exact module semantics ---
    out = attention_forward(query, w, b, key, value)
    out = jax.block_until_ready(out)
    ref = _reference_single(query, w, b, key, value)
    assert out.shape == (v_dim,)
    assert jnp.allclose(out, ref, atol=1e-4, rtol=1e-4), (out, ref)

    # --- batched path: many queries, grid over query blocks ---
    Bq, block_q = 16, 8
    queries = jax.random.normal(kqb, (Bq, q_dim), dtype=jnp.float32)
    out_b = attention_forward_batched(queries, w, b, key, value, block_q=block_q)
    out_b = jax.block_until_ready(out_b)
    ref_b = jax.vmap(lambda qv: _reference_single(qv, w, b, key, value))(queries)
    assert out_b.shape == (Bq, v_dim)
    assert jnp.allclose(out_b, ref_b, atol=1e-4, rtol=1e-4), (out_b, ref_b)

    print("KERNEL_OK")
</pallas_src>

<mosaic_0001>
module attributes {stable_mosaic.version = 11 : i64} {
  func.func @_attention_kernel(%arg0: i32, %arg1: memref<1x32xf32, #tpu.memory_space<vmem>>, %arg2: memref<32x32xf32, #tpu.memory_space<vmem>>, %arg3: memref<1x32xf32, #tpu.memory_space<vmem>>, %arg4: memref<8x32xf32, #tpu.memory_space<vmem>>, %arg5: memref<8x16xf32, #tpu.memory_space<vmem>>, %arg6: memref<1x16xf32, #tpu.memory_space<vmem>>) attributes {dimension_semantics = [#tpu.dimension_semantics<parallel>], iteration_bounds = array<i64: 1>, scalar_prefetch = 0 : i64, scratch_operands = 0 : i64, tpu.core_type = #tpu.core_type<tc>, window_params = [{transform_indices = @transform_0, window_bounds = array<i64: 1, 32>}, {pipeline_mode = #tpu.pipeline_mode<synchronous>, transform_indices = @transform_1, window_bounds = array<i64: 32, 32>}, {pipeline_mode = #tpu.pipeline_mode<synchronous>, transform_indices = @transform_2, window_bounds = array<i64: 1, 32>}, {pipeline_mode = #tpu.pipeline_mode<synchronous>, transform_indices = @transform_3, window_bounds = array<i64: 8, 32>}, {pipeline_mode = #tpu.pipeline_mode<synchronous>, transform_indices = @transform_4, window_bounds = array<i64: 8, 16>}, {transform_indices = @transform_5, window_bounds = array<i64: 1, 16>}]} {
    %c0 = arith.constant 0 : index
    %c0_0 = arith.constant 0 : index
    %0 = vector.load %arg1[%c0, %c0_0] : memref<1x32xf32, #tpu.memory_space<vmem>>, vector<1x32xf32>
    %c0_1 = arith.constant 0 : index
    %c0_2 = arith.constant 0 : index
    %1 = vector.load %arg2[%c0_1, %c0_2] : memref<32x32xf32, #tpu.memory_space<vmem>>, vector<32x32xf32>
    %cst = arith.constant dense<0.000000e+00> : vector<1x32xf32>
    %2 = tpu.matmul %0, %1, %cst {dimension_numbers = #tpu.dot_dimension_numbers<[1], [0], [0], [1], [0, 0, 1, 1], [], []>} : vector<1x32xf32>, vector<32x32xf32>, vector<1x32xf32> -> vector<1x32xf32>
    %c0_3 = arith.constant 0 : index
    %c0_4 = arith.constant 0 : index
    %3 = vector.load %arg3[%c0_3, %c0_4] : memref<1x32xf32, #tpu.memory_space<vmem>>, vector<1x32xf32>
    %4 = arith.addf %2, %3 : vector<1x32xf32>
    %c0_5 = arith.constant 0 : index
    %c0_6 = arith.constant 0 : index
    %5 = vector.load %arg4[%c0_5, %c0_6] : memref<8x32xf32, #tpu.memory_space<vmem>>, vector<8x32xf32>
    %cst_7 = arith.constant dense<0.000000e+00> : vector<1x8xf32>
    %6 = tpu.matmul %4, %5, %cst_7 {dimension_numbers = #tpu.dot_dimension_numbers<[1], [1], [0], [0], [0, 0, 1, 0], [], []>} : vector<1x32xf32>, vector<8x32xf32>, vector<1x8xf32> -> vector<1x8xf32>
    %cst_8 = arith.constant dense<0xFF800000> : vector<1xf32>
    %7 = vector.multi_reduction <maximumf>, %6, %cst_8 [1] : vector<1x8xf32> to vector<1xf32>
    %8 = vector.shape_cast %7 : vector<1xf32> to vector<1x1xf32>
    %9 = vector.broadcast %8 : vector<1x1xf32> to vector<1x8xf32>
    %10 = arith.subf %6, %9 : vector<1x8xf32>
    %11 = math.exp %10 : vector<1x8xf32>
    %cst_9 = arith.constant dense<0.000000e+00> : vector<1xf32>
    %12 = vector.multi_reduction <add>, %11, %cst_9 [1] : vector<1x8xf32> to vector<1xf32>
    %13 = vector.shape_cast %12 : vector<1xf32> to vector<1x1xf32>
    %c0_10 = arith.constant 0 : index
    %c0_11 = arith.constant 0 : index
    %14 = vector.load %arg5[%c0_10, %c0_11] : memref<8x16xf32, #tpu.memory_space<vmem>>, vector<8x16xf32>
    %cst_12 = arith.constant dense<0.000000e+00> : vector<1x16xf32>
    %15 = tpu.matmul %11, %14, %cst_12 {dimension_numbers = #tpu.dot_dimension_numbers<[1], [0], [0], [1], [0, 0, 1, 1], [], []>} : vector<1x8xf32>, vector<8x16xf32>, vector<1x16xf32> -> vector<1x16xf32>
    %16 = vector.broadcast %13 : vector<1x1xf32> to vector<1x16xf32>
    %17 = arith.divf %15, %16 : vector<1x16xf32>
    %c0_13 = arith.constant 0 : index
    %c0_14 = arith.constant 0 : index
    %18 = vector.load %arg6[%c0_13, %c0_14] : memref<1x16xf32, #tpu.memory_space<vmem>>, vector<1x16xf32>
    tpu.vector_store %arg6[%c0_13, %c0_14], %17 {strides = array<i32>} : memref<1x16xf32, #tpu.memory_space<vmem>>, vector<1x16xf32>,
    return
  }
  func.func @transform_0(%arg0: i32) -> (i32, i32) {
    %c0_i32 = arith.constant 0 : i32
    %c0_i32_0 = arith.constant 0 : i32
    return %arg0, %c0_i32 : i32, i32
  }
  func.func @transform_1(%arg0: i32) -> (i32, i32) {
    %c0_i32 = arith.constant 0 : i32
    %c0_i32_0 = arith.constant 0 : i32
    %c0_i32_1 = arith.constant 0 : i32
    return %c0_i32, %c0_i32_0 : i32, i32
  }
  func.func @transform_2(%arg0: i32) -> (i32, i32) {
    %c0_i32 = arith.constant 0 : i32
    %c0_i32_0 = arith.constant 0 : i32
    %c0_i32_1 = arith.constant 0 : i32
    return %c0_i32, %c0_i32_0 : i32, i32
  }
  func.func @transform_3(%arg0: i32) -> (i32, i32) {
    %c0_i32 = arith.constant 0 : i32
    %c0_i32_0 = arith.constant 0 : i32
    %c0_i32_1 = arith.constant 0 : i32
    return %c0_i32, %c0_i32_0 : i32, i32
  }
  func.func @transform_4(%arg0: i32) -> (i32, i32) {
    %c0_i32 = arith.constant 0 : i32
    %c0_i32_0 = arith.constant 0 : i32
    %c0_i32_1 = arith.constant 0 : i32
    return %c0_i32, %c0_i32_0 : i32, i32
  }
  func.func @transform_5(%arg0: i32) -> (i32, i32) {
    %c0_i32 = arith.constant 0 : i32
    %c0_i32_0 = arith.constant 0 : i32
    return %arg0, %c0_i32 : i32, i32
  }
}

</mosaic_0001>

<bundles_post_ra>
// kernel: tpu_custom_call.1
= control target key start
LH: loop header
LB: loop body
LE: loop exit
PB: predicated region body
PF: predicated region fallthrough
CT: control target
= control target key end

     0   :  { %10 = vsyncpa [#allocation3], 0  ;;  %s563_s0 = inlined_call_operand.hbm [shape: f32[1,32], index: 0, kind: input, shape index: {}]   ;;  %s564_s1 = inlined_call_operand.hbm [shape: f32[32,32], index: 1, kind: input, shape index: {}]   ;;  %s565_s2 = inlined_call_operand.vmem [shape: f32[1,32], index: 2, kind: input, shape index: {}]   ;;  %s566_s3 = inlined_call_operand.vmem [shape: f32[8,32], index: 3, kind: input, shape index: {}]   ;;  %s567_s4 = inlined_call_operand.hbm [shape: f32[8,16], index: 4, kind: input, shape index: {}]   ;;  %s568_s5 = inlined_call_operand.hbm [shape: f32[1,16], index: 5, kind: output, shape index: {}]  }
   0x1   :  { %11 = vsyncpa [#allocation6], 0 }
   0x2   :  { %12 = vsyncpa [#allocation4], 0  ;;  %s467_s18 = smov [#allocation5]   ;;  %s373_s22 = scalar_lea.hbm %s564_s1, 512 }
   0x3   :  { %s28_s19 = sshll.u32 %s467_s18, 4  ;;  %p374_p0 = scmp.ne.s32.totalorder %s564_s1, %s373_s22  ;;  %s29_s19 = int_to_ptr.vmem [resolvable:$true] %s28_s19 }
   0x4   :  { %p377_p1 = scmp.lt.u32.totalorder %s373_s22, %s564_s1 }
   0x6   :  { %p379_p2 = pnand %p377_p1, %p374_p0 }
   0x8   :  { %382 = shalt.err (!%p379_p2)
}
   0x9   :  { %s383_s27 = scalar_lea.vmem %s29_s19, 512  ;;  %p388_p4 = scmp.lt.s32.totalorder %s29_s19, %s29_s19 }
   0xa   :  { %p384_p3 = scmp.ne.s32.totalorder %s29_s19, %s383_s27  ;;  %p389_p5 = scmp.lt.s32.totalorder %s383_s27, %s383_s27 }
   0xc   :  { %p390_p6 = por %p389_p5, %p388_p4 }
   0xe   :  { %p391_p7 = pnand %p390_p6, %p384_p3 }
  0x10   :  { %394 = shalt.err (!%p391_p7)
}
  0x11   :  { %s468_s28 = smov 128   ;;  %s469_s29 = smov 8  }
  0x12   :  { %34 = dma.hbm_to_vmem [thread:$0]  %s564_s1, 512, %s29_s19, [#allocation6], %s468_s28, %s468_s28, %s469_s29  }
  0x13   :  { %s470_s7 = smov [#allocation2]   ;;  %s471_s9 = smov [#allocation7]  }
  0x14   :  { %s19_s8 = sshll.u32 %s470_s7, 4  ;;  %s45_s10 = sshll.u32 %s471_s9, 4  ;;  %s20_s8 = int_to_ptr.vmem [resolvable:$true] %s19_s8  ;;  %s46_s10 = int_to_ptr.vmem [resolvable:$true] %s45_s10 }
  0x15   :  { %s395_s13 = scalar_lea.hbm %s563_s0, 16 }
  0x16   :  { %p396_p8 = scmp.ne.s32.totalorder %s563_s0, %s395_s13  ;;  %p399_p9 = scmp.lt.u32.totalorder %s395_s13, %s563_s0 }
  0x18   :  { %p401_p10 = pnand %p399_p9, %p396_p8 }
  0x1a   :  { %404 = shalt.err (!%p401_p10)
}
  0x1b   :  { %s405_s1 = scalar_lea.vmem %s20_s8, 16  ;;  %s409_s18 = scalar_lea.vmem %s20_s8, 32 }
  0x1c   :  { %p406_p11 = scmp.ne.s32.totalorder %s20_s8, %s405_s1  ;;  %p410_p12 = scmp.lt.s32.totalorder %s20_s8, %s20_s8 }
  0x1d   :  { %p411_p13 = scmp.lt.s32.totalorder %s409_s18, %s405_s1 }
  0x1f   :  { %p412_p0 = por %p411_p13, %p410_p12 }
  0x21   :  { %p413_p1 = pnand %p412_p0, %p406_p11 }
  0x23   :  { %416 = shalt.err (!%p413_p1)
}
  0x24   :  { %22 = dma.hbm_to_vmem [thread:$0]  %s563_s0, 16, %s20_s8, [#allocation3]  }
  0x25   :  { %s417_s23 = scalar_lea.hbm %s567_s4, 128 }
  0x26   :  { %p418_p2 = scmp.ne.s32.totalorder %s567_s4, %s417_s23  ;;  %p421_p3 = scmp.lt.u32.totalorder %s417_s23, %s567_s4 }
  0x28   :  { %p423_p4 = pnand %p421_p3, %p418_p2 }
  0x2a   :  { %426 = shalt.err (!%p423_p4)
}
  0x2b   :  { %s427_s28 = scalar_lea.vmem %s46_s10, 128  ;;  %p432_p6 = scmp.lt.s32.totalorder %s46_s10, %s46_s10 }
  0x2c   :  { %p428_p5 = scmp.ne.s32.totalorder %s46_s10, %s427_s28  ;;  %p433_p7 = scmp.lt.s32.totalorder %s427_s28, %s427_s28 }
  0x2e   :  { %p434_p8 = por %p433_p7, %p432_p6 }
  0x30   :  { %p435_p9 = pnand %p434_p8, %p428_p5 }
  0x32   :  { %438 = shalt.err (!%p435_p9)
}
  0x33   :  { %48 = dma.hbm_to_vmem [thread:$0]  %s567_s4, 128, %s46_s10, [#allocation6]  }
  0x34   :  { %461 = dma.done.wait [#allocation3], 16  }
  0x35   :  { %462 = vsyncadd [#allocation3], 4294967280 }
  0x36   :  { %463 = dma.done.wait [#allocation6], 640  }
  0x37   :  { %464 = vsyncadd [#allocation6], 4294966656  ;;  %v472_v0 = vmov 0.0|0.0   ;;  %vm473_vm0 = vmmov 0   ;;  %v474_v1 = vmov 0.0   ;;  %v59_v2 = vld [vmem:[#allocation5] sm:$0xff] }
  0x38   :  { %354 = vmatprep.subr.bf16.mxu0 %v472_v0  ;;  %341 = vmatprep.mubr.msk.f32.mxu0 %vm473_vm0, %v474_v1  ;;  %v60_v3 = vld [vmem:[#allocation5 + $0x8] sm:$0xff]  ;;  %v61_v4 = vld [vmem:[#allocation5 + $0x10] sm:$0xff]  ;;  %v62_v6 = vld [vmem:[#allocation5 + $0x18] sm:$0xff]  ;;  %vm64_vm1 = vcmask 261120   ;;  %vm215_vm2 = vcmask 57344   ;;  %vm226_vm3 = vcmask 64512  }
  0x39   :  { %344 = vmatprep.subr.mxu1 %v474_v1  ;;  %346 = vmatprep.mubr.msk.f32.mxu1 %vm473_vm0, %v474_v1  ;;  %v355_v5 = vpack.c.bf16 %v60_v3, %v59_v2  ;;  %v358_v7 = vpack.c.bf16 %v62_v6, %v61_v4  ;;  %v58_v8 = vld [vmem:[#allocation2] sm:$0x1]  ;;  %v138_v9 = vld [vmem:[%s566_s3] sm:$0xff]  ;;  %v225_v17 = vld [vmem:[#allocation7] sm:$0xff]  ;;  %vm302_vm4 = vcmask 122880  }
  0x3a   :  { %345 = vmatpush3.xpose.msk.msra.mxu1 %vm64_vm1, %v138_v9  ;;  %v63_v10 = vld [vmem:[%s565_s2] sm:$0x1]  ;;  %s475_s2 = smov [#allocation8]  }
  0x3b   :  { %356 = vmatpush3.bf16.msra.mxu0 %v355_v5  ;;  %349 = vmatprep.subr.mxu1 %v474_v1  ;;  %s310_s3 = sshll.u32 %s475_s2, 4  ;;  %s311_s3 = int_to_ptr.vmem [resolvable:$true] %s310_s3 }
  0x3c   :  { %357 = vmatprep.subr.bf16.mxu0 %v472_v0  ;;  %s439_s8 = scalar_lea.vmem %s311_s3, 16  ;;  %s443_s9 = scalar_lea.vmem %s311_s3, 32 }
  0x3d   :  { %p440_p10 = scmp.ne.s32.totalorder %s311_s3, %s439_s8  ;;  %p444_p11 = scmp.lt.s32.totalorder %s311_s3, %s311_s3 }
  0x3e   :  { %p445_p12 = scmp.lt.s32.totalorder %s443_s9, %s439_s8 }
  0x3f   :  { %359 = vmatpush3.bf16.msra.mxu0 %v358_v7 }
  0x40   :  { %p446_p13 = por %p445_p12, %p444_p11 }
  0x42   :  { %342 = vmatmul.mubr.msk.f32.vlgmr.msra.gmra.mrb[0].mxu0 %vm64_vm1, %v58_v8  ;;  %p447_p0 = pnand %p446_p13, %p440_p10 }
 0x115   :  { %v134_v11 = vpop.f32.mrb[0].mxu0 }
 0x116   :  { %v135_v12 = vadd.f32 %v134_v11, %v63_v10  ;;  %v343_v13 = vpop.f32.mrb[1].mxu0 }
 0x118   :  { %347 = vmatmul.mubr.msk.f32.vlgmr.msra.gmra.mrb[0].mxu1 %vm64_vm1, %v135_v12 }
 0x119   :  { %351 = vmatprep.mubr.msk.f32.mxu1 %vm473_vm0, %v474_v1  ;;  %350 = vmatpush3.msra.mxu1 %v225_v17 }
 0x1eb   :  { %v211_v14 = vpop.f32.mrb[0].mxu1 }
 0x1ec   :  { %v348_v15 = vpop.f32.mrb[1].mxu1  ;;  %v216_v16 = vsel %vm215_vm2, %v211_v14, -inf }
 0x1ed   :  { %217 = vmax.xlane.f32.xlu0 %v216_v16 }
 0x27a   :  { %v218_v18 = vpop.xlane.xlu0 %217 }
 0x27b   :  { %v219_v19 = vsub.f32 %v211_v14, %v218_v18 }
 0x27d   :  { %v220_v20 = vmul.f32 1.442695, %v219_v19 }
 0x27f   :  { %369 = vpow2.f32 %v220_v20 }
 0x289   :  { %v370_v21 = vpop.eup %369 }
 0x28a   :  { %352 = vmatmul.mubr.msk.f32.vlgmr.msra.gmra.mrb[2].mxu1 %vm226_vm3, %v370_v21  ;;  %v222_v22 = vsel %vm215_vm2, %v370_v21, 0.0 }
 0x28b   :  { %223 = vadd.xlane.f32.xlu0 %v222_v22 }
 0x318   :  { %v224_v23 = vpop.xlane.xlu0 %223 }
 0x319   :  { %371 = vrcp.f32 %v224_v23 }
 0x323   :  { %v372_v24 = vpop.eup %371 }
 0x35d   :  { %v296_v25 = vpop.f32.mrb[2].mxu1 }
 0x35e   :  { %v301_v26 = vmul.f32 %v372_v24, %v296_v25  ;;  %v353_v27 = vpop.f32.mrb[3].mxu1 }
 0x360   :  { %303 = vst.msk [vmem:[#allocation8] sm:$0x1] %vm302_vm4, %v301_v26 }
 0x361   :  { %450 = shalt.err (!%p447_p0)
}
 0x362   :  { %s451_s12 = scalar_lea.hbm %s568_s5, 16 }
 0x363   :  { %p452_p1 = scmp.ne.s32.totalorder %s568_s5, %s451_s12  ;;  %p455_p2 = scmp.lt.u32.totalorder %s451_s12, %s568_s5 }
 0x365   :  { %p457_p3 = pnand %p455_p2, %p452_p1 }
 0x367   :  { %460 = shalt.err (!%p457_p3)
}
 0x368   :  { %313 = dma.vmem_to_hbm [thread:$0]  %s311_s3, 16, %s568_s5, [#allocation4]  }
 0x369   :  { %465 = dma.done.wait [#allocation4], 16  }
 0x36a   :  { %466 = vsyncadd [#allocation4], 4294967280 }
 0x36b   :  { %317 = vsyncpa [#allocation3], 1 }
 0x36c   :  { %318 = vsyncpa [#allocation6], 1 }
 0x36d   :  { %319 = vsyncpa [#allocation4], 1 }

</bundles_post_ra>
